<compile_context>
chip_gen: v7x
topology: tpu7x:2x2x1
jax: 0.10.0
libtpu: 0.0.40
codegen_flags: <defaults>
</compile_context>

<pallas_src>
import functools

import jax
import jax.numpy as jnp
from jax import lax
from jax.experimental import pallas as pl
from jax.experimental.pallas import tpu as pltpu

_HEAD_LANES = 128   # fused-head / output lane width (lane-dense store)
_SUBLANES = 8       # f32 sublane multiple


def _round_up(n, m):
    return ((n + m - 1) // m) * m


def multitask_kernel(
    x_ref,      # (T*Bp, I)  f32, time-major, batch padded to 8, flattened
    slab_ref,   # (R, LW)    f32, packed [W_ih.T | W_hh.T | W_sh.T | W_heads | biases]
    out_ref,    # (Bp, 128)  f32, [softmax_inf | softmax_org | sigmoid_sep | 0 pad]
    *,
    seq_len, batch_p, in_size, hidden, num_inf, num_org,
    r_wih, r_whh, r_wsh, r_whd, r_bias,
):
    T, Bp, I, H = seq_len, batch_p, in_size, hidden
    G = 4 * H

    # ---- Unpack the parameter slab (static, sublane-aligned windows). ------------
    w_ih = slab_ref[pl.ds(r_wih, I), :][:, :G]               # (I, 4H), order (i,f,o,g)
    w_hh = slab_ref[pl.ds(r_whh, H), :][:, :G]               # (H, 4H)
    w_sh = slab_ref[pl.ds(r_wsh, H), :][:, :H]               # (H, H)
    w_hd = slab_ref[pl.ds(r_whd, H), :][:, :_HEAD_LANES]     # (H, 128)
    b_rows = slab_ref[pl.ds(r_bias, _SUBLANES), :]           # aligned 8-row load
    b_lstm = b_rows[0:1, :G]                                  # (1, 4H) = b_ih + b_hh
    b_sh = b_rows[1:2, :H]                                    # (1, H)
    b_hd = b_rows[2:3, :_HEAD_LANES]                          # (1, 128)

    # ---- Hoisted input projection: ONE MXU pass for every timestep, bias folded. -
    xg = jnp.dot(x_ref[...], w_ih, preferred_element_type=jnp.float32) + b_lstm

    # Lane-dependent constants turning one full-width tanh into
    # sigmoid on lanes [0, 3H) (i, f, o) and tanh on lanes [3H, 4H) (g):
    #     sigmoid(x) = 0.5 * tanh(0.5 * x) + 0.5
    lane4 = lax.broadcasted_iota(jnp.int32, (Bp, G), 1)
    is_sig = lane4 < 3 * H
    pre_scale = jnp.where(is_sig, 0.5, 1.0)
    post_scale = jnp.where(is_sig, 0.5, 1.0)
    post_shift = jnp.where(is_sig, 0.5, 0.0)

    h = jnp.zeros((Bp, H), jnp.float32)
    c = jnp.zeros((Bp, H), jnp.float32)

    # ---- Serial recurrence, fully unrolled (T static & small); state in vregs. ---
    # Per step: 1 MXU matmul + 2 EUP pushes (fused gate tanh, tanh(c)).
    for t in range(T):
        gates = xg[t * Bp:(t + 1) * Bp, :] + jnp.dot(
            h, w_hh, preferred_element_type=jnp.float32)
        act = jnp.tanh(gates * pre_scale) * post_scale + post_shift
        i_g = act[:, 0 * H:1 * H]
        f_g = act[:, 1 * H:2 * H]
        o_g = act[:, 2 * H:3 * H]
        g_g = act[:, 3 * H:4 * H]
        c = f_g * c + i_g * g_g
        h = o_g * jnp.tanh(c)

    # ---- Shared FC + ReLU on the final hidden state. ------------------------------
    shared = jnp.maximum(
        jnp.dot(h, w_sh, preferred_element_type=jnp.float32) + b_sh, 0.0)

    # ---- Fused heads -> one (Bp, 128) logit block. --------------------------------
    logits = jnp.dot(shared, w_hd, preferred_element_type=jnp.float32) + b_hd

    # Full-width masked epilogue: both softmaxes AND the sigmoid share a single exp
    # over the whole (Bp, 128) vreg.  Lane layout:
    #   [0, ci)       infection logits
    #   [ci, ci+co)   organ logits
    #   ci+co         sepsis logit
    #   ci+co+1       zero helper lane -> exp(-m_sep) supplies the sigmoid's "+1"
    ci, co = num_inf, num_org
    sep = ci + co
    lane = lax.broadcasted_iota(jnp.int32, (Bp, _HEAD_LANES), 1)
    in_inf = lane < ci
    in_org = (lane >= ci) & (lane < sep)
    in_sep = lane == sep
    in_sepd = (lane >= sep) & (lane < sep + 2)

    m_inf = jnp.max(jnp.where(in_inf, logits, -jnp.inf), axis=1, keepdims=True)
    m_org = jnp.max(jnp.where(in_org, logits, -jnp.inf), axis=1, keepdims=True)
    m_sep = jnp.maximum(
        jnp.max(jnp.where(in_sep, logits, -jnp.inf), axis=1, keepdims=True), 0.0)

    shift = jnp.where(in_inf, m_inf, jnp.where(in_org, m_org, m_sep))
    e = jnp.exp(logits - shift)                     # ONE EUP push for the whole tail
    d_inf = jnp.sum(jnp.where(in_inf, e, 0.0), axis=1, keepdims=True)
    d_org = jnp.sum(jnp.where(in_org, e, 0.0), axis=1, keepdims=True)
    d_sep = jnp.sum(jnp.where(in_sepd, e, 0.0), axis=1, keepdims=True)  # e^(x-m)+e^-m
    denom = jnp.where(in_inf, d_inf, jnp.where(in_org, d_org, d_sep))

    # Exact division (pl.reciprocal(approx=True) was skipped to keep the 1e-3 check).
    result = jnp.where(in_inf | in_org | in_sep, e / denom, 0.0)
    out_ref[...] = result                            # single unmasked 128-lane store


def multitask_forward(x, params):
    """x: (B, T, I) batch-first like the PyTorch module. Returns (inf, org, sep)."""
    B, T, I = x.shape
    H = params["hidden"]
    ci = params["num_infection_classes"]
    co = params["num_organ_classes"]

    Bp = _round_up(B, _SUBLANES)       # pad batch to the f32 sublane multiple
    x_tm = jnp.transpose(x, (1, 0, 2))                     # (T, B, I) time-major
    if Bp != B:
        x_tm = jnp.pad(x_tm, ((0, 0), (0, Bp - B), (0, 0)))
    x_flat = x_tm.reshape(T * Bp, I)                       # flatten outside the kernel

    r_wih, r_whh, r_wsh, r_whd, r_bias = params["offsets"]
    kernel = functools.partial(
        multitask_kernel,
        seq_len=T, batch_p=Bp, in_size=I, hidden=H, num_inf=ci, num_org=co,
        r_wih=r_wih, r_whh=r_whh, r_wsh=r_wsh, r_whd=r_whd, r_bias=r_bias)

    vmem = pl.BlockSpec(memory_space=pltpu.MemorySpace.VMEM)
    fused = pl.pallas_call(
        kernel,
        out_shape=jax.ShapeDtypeStruct((Bp, _HEAD_LANES), jnp.float32),
        in_specs=[vmem, vmem],          # exactly 2 input DMAs: x + packed param slab
        out_specs=vmem,
    )(x_flat, params["slab"])

    inf = fused[:B, :ci]
    org = fused[:B, ci:ci + co]
    sep = fused[:B, ci + co:ci + co + 1]
    return inf, org, sep


def init_raw_params(key, input_size, hidden_size, num_infection_classes, num_organ_classes):
    """Torch-layout parameters (nn.LSTM / nn.Linear shapes, gate order i,f,g,o)."""
    ks = jax.random.split(key, 12)
    H = hidden_size
    s = 1.0 / jnp.sqrt(jnp.float32(H))

    def u(k, shape):
        return jax.random.uniform(k, shape, jnp.float32, -s, s)

    return {
        "w_ih": u(ks[0], (4 * H, input_size)),
        "w_hh": u(ks[1], (4 * H, H)),
        "b_ih": u(ks[2], (4 * H,)),
        "b_hh": u(ks[3], (4 * H,)),
        "w_sh": u(ks[4], (H, H)),
        "b_sh": u(ks[5], (H,)),
        "w_inf": u(ks[6], (num_infection_classes, H)),
        "b_inf": u(ks[7], (num_infection_classes,)),
        "w_org": u(ks[8], (num_organ_classes, H)),
        "b_org": u(ks[9], (num_organ_classes,)),
        "w_sep": u(ks[10], (1, H)),
        "b_sep": u(ks[11], (1,)),
    }


def prepare_params(raw, num_infection_classes, num_organ_classes):
    """Kernel layout: transposed weights, (i,f,o,g) gate order, fused heads, and
    everything packed into ONE lane-aligned f32 slab (a single HBM->VMEM DMA)."""
    H = raw["w_hh"].shape[1]
    I = raw["w_ih"].shape[1]
    G = 4 * H
    assert num_infection_classes + num_organ_classes + 2 <= _HEAD_LANES
    lane_width = max(G, _HEAD_LANES)

    def reorder(a):  # torch gate order (i, f, g, o) -> kernel order (i, f, o, g)
        return jnp.concatenate(
            [a[0 * H:1 * H], a[1 * H:2 * H], a[3 * H:4 * H], a[2 * H:3 * H]], axis=0)

    w_ih_t = reorder(raw["w_ih"]).T                          # (I, 4H)
    w_hh_t = reorder(raw["w_hh"]).T                          # (H, 4H)
    b_lstm = reorder(raw["b_ih"] + raw["b_hh"])[None, :]     # (1, 4H)
    w_sh_t = raw["w_sh"].T                                   # (H, H)
    b_sh = raw["b_sh"][None, :]                              # (1, H)

    w_heads = jnp.concatenate(
        [raw["w_inf"].T, raw["w_org"].T, raw["w_sep"].T], axis=1)   # (H, ci+co+1)
    b_heads = jnp.concatenate(
        [raw["b_inf"], raw["b_org"], raw["b_sep"]])[None, :]
    w_heads = jnp.pad(w_heads, ((0, 0), (0, _HEAD_LANES - w_heads.shape[1])))
    b_heads = jnp.pad(b_heads, ((0, 0), (0, _HEAD_LANES - b_heads.shape[1])))

    def to_lanes(a):
        return jnp.pad(a, ((0, 0), (0, lane_width - a.shape[1])))

    bias_rows = jnp.concatenate(
        [to_lanes(b_lstm), to_lanes(b_sh), to_lanes(b_heads)], axis=0)   # (3, LW)

    sections = [to_lanes(w_ih_t), to_lanes(w_hh_t), to_lanes(w_sh_t),
                to_lanes(w_heads), bias_rows]
    offsets, padded, row = [], [], 0
    for sec in sections:
        offsets.append(row)
        rows = _round_up(sec.shape[0], _SUBLANES)
        padded.append(jnp.pad(sec, ((0, rows - sec.shape[0]), (0, 0))))
        row += rows
    slab = jnp.concatenate(padded, axis=0).astype(jnp.float32)

    return {
        "slab": slab,                      # (R, lane_width) packed parameters
        "offsets": tuple(offsets),         # (r_wih, r_whh, r_wsh, r_whd, r_bias)
        "hidden": H,
        "num_infection_classes": num_infection_classes,
        "num_organ_classes": num_organ_classes,
    }


def _reference_forward(x, raw):
    """Pure-JAX reference replicating torch semantics (torch gate order i,f,g,o)."""
    B, T, _ = x.shape
    H = raw["w_hh"].shape[1]
    h = jnp.zeros((B, H), jnp.float32)
    c = jnp.zeros((B, H), jnp.float32)
    for t in range(T):
        g = (x[:, t, :] @ raw["w_ih"].T + h @ raw["w_hh"].T
             + raw["b_ih"] + raw["b_hh"])
        i_g = jax.nn.sigmoid(g[:, 0 * H:1 * H])
        f_g = jax.nn.sigmoid(g[:, 1 * H:2 * H])
        g_g = jnp.tanh(g[:, 2 * H:3 * H])
        o_g = jax.nn.sigmoid(g[:, 3 * H:4 * H])
        c = f_g * c + i_g * g_g
        h = o_g * jnp.tanh(c)
    shared = jax.nn.relu(h @ raw["w_sh"].T + raw["b_sh"])
    inf = jax.nn.softmax(shared @ raw["w_inf"].T + raw["b_inf"], axis=1)
    org = jax.nn.softmax(shared @ raw["w_org"].T + raw["b_org"], axis=1)
    sep = jax.nn.sigmoid(shared @ raw["w_sep"].T + raw["b_sep"])
    return inf, org, sep


if __name__ == "__main__":
    B, T = 2, 8
    input_size, hidden_size = 16, 32
    num_infection_classes, num_organ_classes = 4, 6

    key = jax.random.PRNGKey(0)
    kx, kp = jax.random.split(key)
    x = jax.random.normal(kx, (B, T, input_size), jnp.float32)
    raw = init_raw_params(kp, input_size, hidden_size,
                          num_infection_classes, num_organ_classes)
    params = prepare_params(raw, num_infection_classes, num_organ_classes)

    inf, org, sep = jax.block_until_ready(multitask_forward(x, params))

    inf_r, org_r, sep_r = _reference_forward(x, raw)
    assert inf.shape == (B, num_infection_classes)
    assert org.shape == (B, num_organ_classes)
    assert sep.shape == (B, 1)
    # Tolerance covers matmul-precision differences between the in-kernel MXU dots
    # and XLA's default-precision f32 dots in the reference.
    assert jnp.allclose(inf, inf_r, atol=2e-3), "infection head mismatch"
    assert jnp.allclose(org, org_r, atol=2e-3), "organ head mismatch"
    assert jnp.allclose(sep, sep_r, atol=2e-3), "sepsis head mismatch"

    print("KERNEL_OK")
</pallas_src>

<mosaic_0001>
module attributes {stable_mosaic.version = 11 : i64} {
  func.func @multitask_kernel(%arg0: memref<64x16xf32, #tpu.memory_space<vmem>>, %arg1: memref<120x128xf32, #tpu.memory_space<vmem>>, %arg2: memref<8x128xf32, #tpu.memory_space<vmem>>) attributes {dimension_semantics = [], scalar_prefetch = 0 : i64, scratch_operands = 0 : i64, tpu.core_type = #tpu.core_type<tc>} {
    %c0 = arith.constant 0 : index
    %c0_0 = arith.constant 0 : index
    %0 = vector.load %arg1[%c0, %c0_0] : memref<120x128xf32, #tpu.memory_space<vmem>>, vector<16x128xf32>
    %c16 = arith.constant 16 : index
    %c0_1 = arith.constant 0 : index
    %1 = vector.load %arg1[%c16, %c0_1] : memref<120x128xf32, #tpu.memory_space<vmem>>, vector<32x128xf32>
    %c48 = arith.constant 48 : index
    %c0_2 = arith.constant 0 : index
    %2 = vector.load %arg1[%c48, %c0_2] : memref<120x128xf32, #tpu.memory_space<vmem>>, vector<32x128xf32>
    %3 = vector.extract_strided_slice %2 {offsets = [0, 0], sizes = [32, 32], strides = [1, 1]} : vector<32x128xf32> to vector<32x32xf32>
    %c80 = arith.constant 80 : index
    %c0_3 = arith.constant 0 : index
    %4 = vector.load %arg1[%c80, %c0_3] : memref<120x128xf32, #tpu.memory_space<vmem>>, vector<32x128xf32>
    %c112 = arith.constant 112 : index
    %c0_4 = arith.constant 0 : index
    %5 = vector.load %arg1[%c112, %c0_4] : memref<120x128xf32, #tpu.memory_space<vmem>>, vector<8x128xf32>
    %6 = vector.extract_strided_slice %5 {offsets = [0, 0], sizes = [1, 128], strides = [1, 1]} : vector<8x128xf32> to vector<1x128xf32>
    %7 = vector.extract_strided_slice %5 {offsets = [1, 0], sizes = [1, 32], strides = [1, 1]} : vector<8x128xf32> to vector<1x32xf32>
    %8 = vector.extract_strided_slice %5 {offsets = [2, 0], sizes = [1, 128], strides = [1, 1]} : vector<8x128xf32> to vector<1x128xf32>
    %c0_5 = arith.constant 0 : index
    %c0_6 = arith.constant 0 : index
    %9 = vector.load %arg0[%c0_5, %c0_6] : memref<64x16xf32, #tpu.memory_space<vmem>>, vector<64x16xf32>
    %cst = arith.constant dense<0.000000e+00> : vector<64x128xf32>
    %10 = tpu.matmul %9, %0, %cst {dimension_numbers = #tpu.dot_dimension_numbers<[1], [0], [0], [1], [0, 0, 1, 1], [], []>} : vector<64x16xf32>, vector<16x128xf32>, vector<64x128xf32> -> vector<64x128xf32>
    %11 = vector.broadcast %6 : vector<1x128xf32> to vector<64x128xf32>
    %12 = arith.addf %10, %11 : vector<64x128xf32>
    %13 = tpu.iota {dimensions = array<i32: 1>} : vector<8x128xi32>
    %c96_i32 = arith.constant 96 : i32
    %14 = vector.broadcast %c96_i32 : i32 to vector<8x128xi32>
    %15 = arith.cmpi slt, %13, %14 : vector<8x128xi32>
    %cst_7 = arith.constant 5.000000e-01 : f32
    %cst_8 = arith.constant 1.000000e+00 : f32
    %16 = vector.broadcast %cst_7 : f32 to vector<8x128xf32>
    %17 = vector.broadcast %cst_8 : f32 to vector<8x128xf32>
    %18 = arith.select %15, %16, %17 : vector<8x128xi1>, vector<8x128xf32>
    %cst_9 = arith.constant 5.000000e-01 : f32
    %cst_10 = arith.constant 1.000000e+00 : f32
    %19 = vector.broadcast %cst_9 : f32 to vector<8x128xf32>
    %20 = vector.broadcast %cst_10 : f32 to vector<8x128xf32>
    %21 = arith.select %15, %19, %20 : vector<8x128xi1>, vector<8x128xf32>
    %cst_11 = arith.constant 5.000000e-01 : f32
    %cst_12 = arith.constant 0.000000e+00 : f32
    %22 = vector.broadcast %cst_11 : f32 to vector<8x128xf32>
    %23 = vector.broadcast %cst_12 : f32 to vector<8x128xf32>
    %24 = arith.select %15, %22, %23 : vector<8x128xi1>, vector<8x128xf32>
    %cst_13 = arith.constant 0.000000e+00 : f32
    %25 = vector.broadcast %cst_13 : f32 to vector<8x32xf32>
    %cst_14 = arith.constant 0.000000e+00 : f32
    %26 = vector.broadcast %cst_14 : f32 to vector<8x32xf32>
    %27 = vector.extract_strided_slice %12 {offsets = [0, 0], sizes = [8, 128], strides = [1, 1]} : vector<64x128xf32> to vector<8x128xf32>
    %cst_15 = arith.constant dense<0.000000e+00> : vector<8x128xf32>
    %28 = tpu.matmul %25, %1, %cst_15 {dimension_numbers = #tpu.dot_dimension_numbers<[1], [0], [0], [1], [0, 0, 1, 1], [], []>} : vector<8x32xf32>, vector<32x128xf32>, vector<8x128xf32> -> vector<8x128xf32>
    %29 = arith.addf %27, %28 : vector<8x128xf32>
    %30 = arith.mulf %29, %18 : vector<8x128xf32>
    %31 = math.tanh %30 : vector<8x128xf32>
    %32 = arith.mulf %31, %21 : vector<8x128xf32>
    %33 = arith.addf %32, %24 : vector<8x128xf32>
    %34 = vector.extract_strided_slice %33 {offsets = [0, 0], sizes = [8, 32], strides = [1, 1]} : vector<8x128xf32> to vector<8x32xf32>
    %35 = vector.extract_strided_slice %33 {offsets = [0, 32], sizes = [8, 32], strides = [1, 1]} : vector<8x128xf32> to vector<8x32xf32>
    %36 = vector.extract_strided_slice %33 {offsets = [0, 64], sizes = [8, 32], strides = [1, 1]} : vector<8x128xf32> to vector<8x32xf32>
    %37 = vector.extract_strided_slice %33 {offsets = [0, 96], sizes = [8, 32], strides = [1, 1]} : vector<8x128xf32> to vector<8x32xf32>
    %38 = arith.mulf %35, %26 : vector<8x32xf32>
    %39 = arith.mulf %34, %37 : vector<8x32xf32>
    %40 = arith.addf %38, %39 : vector<8x32xf32>
    %41 = math.tanh %40 : vector<8x32xf32>
    %42 = arith.mulf %36, %41 : vector<8x32xf32>
    %43 = vector.extract_strided_slice %12 {offsets = [8, 0], sizes = [8, 128], strides = [1, 1]} : vector<64x128xf32> to vector<8x128xf32>
    %cst_16 = arith.constant dense<0.000000e+00> : vector<8x128xf32>
    %44 = tpu.matmul %42, %1, %cst_16 {dimension_numbers = #tpu.dot_dimension_numbers<[1], [0], [0], [1], [0, 0, 1, 1], [], []>} : vector<8x32xf32>, vector<32x128xf32>, vector<8x128xf32> -> vector<8x128xf32>
    %45 = arith.addf %43, %44 : vector<8x128xf32>
    %46 = arith.mulf %45, %18 : vector<8x128xf32>
    %47 = math.tanh %46 : vector<8x128xf32>
    %48 = arith.mulf %47, %21 : vector<8x128xf32>
    %49 = arith.addf %48, %24 : vector<8x128xf32>
    %50 = vector.extract_strided_slice %49 {offsets = [0, 0], sizes = [8, 32], strides = [1, 1]} : vector<8x128xf32> to vector<8x32xf32>
    %51 = vector.extract_strided_slice %49 {offsets = [0, 32], sizes = [8, 32], strides = [1, 1]} : vector<8x128xf32> to vector<8x32xf32>
    %52 = vector.extract_strided_slice %49 {offsets = [0, 64], sizes = [8, 32], strides = [1, 1]} : vector<8x128xf32> to vector<8x32xf32>
    %53 = vector.extract_strided_slice %49 {offsets = [0, 96], sizes = [8, 32], strides = [1, 1]} : vector<8x128xf32> to vector<8x32xf32>
    %54 = arith.mulf %51, %40 : vector<8x32xf32>
    %55 = arith.mulf %50, %53 : vector<8x32xf32>
    %56 = arith.addf %54, %55 : vector<8x32xf32>
    %57 = math.tanh %56 : vector<8x32xf32>
    %58 = arith.mulf %52, %57 : vector<8x32xf32>
    %59 = vector.extract_strided_slice %12 {offsets = [16, 0], sizes = [8, 128], strides = [1, 1]} : vector<64x128xf32> to vector<8x128xf32>
    %cst_17 = arith.constant dense<0.000000e+00> : vector<8x128xf32>
    %60 = tpu.matmul %58, %1, %cst_17 {dimension_numbers = #tpu.dot_dimension_numbers<[1], [0], [0], [1], [0, 0, 1, 1], [], []>} : vector<8x32xf32>, vector<32x128xf32>, vector<8x128xf32> -> vector<8x128xf32>
    %61 = arith.addf %59, %60 : vector<8x128xf32>
    %62 = arith.mulf %61, %18 : vector<8x128xf32>
    %63 = math.tanh %62 : vector<8x128xf32>
    %64 = arith.mulf %63, %21 : vector<8x128xf32>
    %65 = arith.addf %64, %24 : vector<8x128xf32>
    %66 = vector.extract_strided_slice %65 {offsets = [0, 0], sizes = [8, 32], strides = [1, 1]} : vector<8x128xf32> to vector<8x32xf32>
    %67 = vector.extract_strided_slice %65 {offsets = [0, 32], sizes = [8, 32], strides = [1, 1]} : vector<8x128xf32> to vector<8x32xf32>
    %68 = vector.extract_strided_slice %65 {offsets = [0, 64], sizes = [8, 32], strides = [1, 1]} : vector<8x128xf32> to vector<8x32xf32>
    %69 = vector.extract_strided_slice %65 {offsets = [0, 96], sizes = [8, 32], strides = [1, 1]} : vector<8x128xf32> to vector<8x32xf32>
    %70 = arith.mulf %67, %56 : vector<8x32xf32>
    %71 = arith.mulf %66, %69 : vector<8x32xf32>
    %72 = arith.addf %70, %71 : vector<8x32xf32>
    %73 = math.tanh %72 : vector<8x32xf32>
    %74 = arith.mulf %68, %73 : vector<8x32xf32>
    %75 = vector.extract_strided_slice %12 {offsets = [24, 0], sizes = [8, 128], strides = [1, 1]} : vector<64x128xf32> to vector<8x128xf32>
    %cst_18 = arith.constant dense<0.000000e+00> : vector<8x128xf32>
    %76 = tpu.matmul %74, %1, %cst_18 {dimension_numbers = #tpu.dot_dimension_numbers<[1], [0], [0], [1], [0, 0, 1, 1], [], []>} : vector<8x32xf32>, vector<32x128xf32>, vector<8x128xf32> -> vector<8x128xf32>
    %77 = arith.addf %75, %76 : vector<8x128xf32>
    %78 = arith.mulf %77, %18 : vector<8x128xf32>
    %79 = math.tanh %78 : vector<8x128xf32>
    %80 = arith.mulf %79, %21 : vector<8x128xf32>
    %81 = arith.addf %80, %24 : vector<8x128xf32>
    %82 = vector.extract_strided_slice %81 {offsets = [0, 0], sizes = [8, 32], strides = [1, 1]} : vector<8x128xf32> to vector<8x32xf32>
    %83 = vector.extract_strided_slice %81 {offsets = [0, 32], sizes = [8, 32], strides = [1, 1]} : vector<8x128xf32> to vector<8x32xf32>
    %84 = vector.extract_strided_slice %81 {offsets = [0, 64], sizes = [8, 32], strides = [1, 1]} : vector<8x128xf32> to vector<8x32xf32>
    %85 = vector.extract_strided_slice %81 {offsets = [0, 96], sizes = [8, 32], strides = [1, 1]} : vector<8x128xf32> to vector<8x32xf32>
    %86 = arith.mulf %83, %72 : vector<8x32xf32>
    %87 = arith.mulf %82, %85 : vector<8x32xf32>
    %88 = arith.addf %86, %87 : vector<8x32xf32>
    %89 = math.tanh %88 : vector<8x32xf32>
    %90 = arith.mulf %84, %89 : vector<8x32xf32>
    %91 = vector.extract_strided_slice %12 {offsets = [32, 0], sizes = [8, 128], strides = [1, 1]} : vector<64x128xf32> to vector<8x128xf32>
    %cst_19 = arith.constant dense<0.000000e+00> : vector<8x128xf32>
    %92 = tpu.matmul %90, %1, %cst_19 {dimension_numbers = #tpu.dot_dimension_numbers<[1], [0], [0], [1], [0, 0, 1, 1], [], []>} : vector<8x32xf32>, vector<32x128xf32>, vector<8x128xf32> -> vector<8x128xf32>
    %93 = arith.addf %91, %92 : vector<8x128xf32>
    %94 = arith.mulf %93, %18 : vector<8x128xf32>
    %95 = math.tanh %94 : vector<8x128xf32>
    %96 = arith.mulf %95, %21 : vector<8x128xf32>
    %97 = arith.addf %96, %24 : vector<8x128xf32>
    %98 = vector.extract_strided_slice %97 {offsets = [0, 0], sizes = [8, 32], strides = [1, 1]} : vector<8x128xf32> to vector<8x32xf32>
    %99 = vector.extract_strided_slice %97 {offsets = [0, 32], sizes = [8, 32], strides = [1, 1]} : vector<8x128xf32> to vector<8x32xf32>
    %100 = vector.extract_strided_slice %97 {offsets = [0, 64], sizes = [8, 32], strides = [1, 1]} : vector<8x128xf32> to vector<8x32xf32>
    %101 = vector.extract_strided_slice %97 {offsets = [0, 96], sizes = [8, 32], strides = [1, 1]} : vector<8x128xf32> to vector<8x32xf32>
    %102 = arith.mulf %99, %88 : vector<8x32xf32>
    %103 = arith.mulf %98, %101 : vector<8x32xf32>
    %104 = arith.addf %102, %103 : vector<8x32xf32>
    %105 = math.tanh %104 : vector<8x32xf32>
    %106 = arith.mulf %100, %105 : vector<8x32xf32>
    %107 = vector.extract_strided_slice %12 {offsets = [40, 0], sizes = [8, 128], strides = [1, 1]} : vector<64x128xf32> to vector<8x128xf32>
    %cst_20 = arith.constant dense<0.000000e+00> : vector<8x128xf32>
    %108 = tpu.matmul %106, %1, %cst_20 {dimension_numbers = #tpu.dot_dimension_numbers<[1], [0], [0], [1], [0, 0, 1, 1], [], []>} : vector<8x32xf32>, vector<32x128xf32>, vector<8x128xf32> -> vector<8x128xf32>
    %109 = arith.addf %107, %108 : vector<8x128xf32>
    %110 = arith.mulf %109, %18 : vector<8x128xf32>
    %111 = math.tanh %110 : vector<8x128xf32>
    %112 = arith.mulf %111, %21 : vector<8x128xf32>
    %113 = arith.addf %112, %24 : vector<8x128xf32>
    %114 = vector.extract_strided_slice %113 {offsets = [0, 0], sizes = [8, 32], strides = [1, 1]} : vector<8x128xf32> to vector<8x32xf32>
    %115 = vector.extract_strided_slice %113 {offsets = [0, 32], sizes = [8, 32], strides = [1, 1]} : vector<8x128xf32> to vector<8x32xf32>
    %116 = vector.extract_strided_slice %113 {offsets = [0, 64], sizes = [8, 32], strides = [1, 1]} : vector<8x128xf32> to vector<8x32xf32>
    %117 = vector.extract_strided_slice %113 {offsets = [0, 96], sizes = [8, 32], strides = [1, 1]} : vector<8x128xf32> to vector<8x32xf32>
    %118 = arith.mulf %115, %104 : vector<8x32xf32>
    %119 = arith.mulf %114, %117 : vector<8x32xf32>
    %120 = arith.addf %118, %119 : vector<8x32xf32>
    %121 = math.tanh %120 : vector<8x32xf32>
    %122 = arith.mulf %116, %121 : vector<8x32xf32>
    %123 = vector.extract_strided_slice %12 {offsets = [48, 0], sizes = [8, 128], strides = [1, 1]} : vector<64x128xf32> to vector<8x128xf32>
    %cst_21 = arith.constant dense<0.000000e+00> : vector<8x128xf32>
    %124 = tpu.matmul %122, %1, %cst_21 {dimension_numbers = #tpu.dot_dimension_numbers<[1], [0], [0], [1], [0, 0, 1, 1], [], []>} : vector<8x32xf32>, vector<32x128xf32>, vector<8x128xf32> -> vector<8x128xf32>
    %125 = arith.addf %123, %124 : vector<8x128xf32>
    %126 = arith.mulf %125, %18 : vector<8x128xf32>
    %127 = math.tanh %126 : vector<8x128xf32>
    %128 = arith.mulf %127, %21 : vector<8x128xf32>
    %129 = arith.addf %128, %24 : vector<8x128xf32>
    %130 = vector.extract_strided_slice %129 {offsets = [0, 0], sizes = [8, 32], strides = [1, 1]} : vector<8x128xf32> to vector<8x32xf32>
    %131 = vector.extract_strided_slice %129 {offsets = [0, 32], sizes = [8, 32], strides = [1, 1]} : vector<8x128xf32> to vector<8x32xf32>
    %132 = vector.extract_strided_slice %129 {offsets = [0, 64], sizes = [8, 32], strides = [1, 1]} : vector<8x128xf32> to vector<8x32xf32>
    %133 = vector.extract_strided_slice %129 {offsets = [0, 96], sizes = [8, 32], strides = [1, 1]} : vector<8x128xf32> to vector<8x32xf32>
    %134 = arith.mulf %131, %120 : vector<8x32xf32>
    %135 = arith.mulf %130, %133 : vector<8x32xf32>
    %136 = arith.addf %134, %135 : vector<8x32xf32>
    %137 = math.tanh %136 : vector<8x32xf32>
    %138 = arith.mulf %132, %137 : vector<8x32xf32>
    %139 = vector.extract_strided_slice %12 {offsets = [56, 0], sizes = [8, 128], strides = [1, 1]} : vector<64x128xf32> to vector<8x128xf32>
    %cst_22 = arith.constant dense<0.000000e+00> : vector<8x128xf32>
    %140 = tpu.matmul %138, %1, %cst_22 {dimension_numbers = #tpu.dot_dimension_numbers<[1], [0], [0], [1], [0, 0, 1, 1], [], []>} : vector<8x32xf32>, vector<32x128xf32>, vector<8x128xf32> -> vector<8x128xf32>
    %141 = arith.addf %139, %140 : vector<8x128xf32>
    %142 = arith.mulf %141, %18 : vector<8x128xf32>
    %143 = math.tanh %142 : vector<8x128xf32>
    %144 = arith.mulf %143, %21 : vector<8x128xf32>
    %145 = arith.addf %144, %24 : vector<8x128xf32>
    %146 = vector.extract_strided_slice %145 {offsets = [0, 0], sizes = [8, 32], strides = [1, 1]} : vector<8x128xf32> to vector<8x32xf32>
    %147 = vector.extract_strided_slice %145 {offsets = [0, 32], sizes = [8, 32], strides = [1, 1]} : vector<8x128xf32> to vector<8x32xf32>
    %148 = vector.extract_strided_slice %145 {offsets = [0, 64], sizes = [8, 32], strides = [1, 1]} : vector<8x128xf32> to vector<8x32xf32>
    %149 = vector.extract_strided_slice %145 {offsets = [0, 96], sizes = [8, 32], strides = [1, 1]} : vector<8x128xf32> to vector<8x32xf32>
    %150 = arith.mulf %147, %136 : vector<8x32xf32>
    %151 = arith.mulf %146, %149 : vector<8x32xf32>
    %152 = arith.addf %150, %151 : vector<8x32xf32>
    %153 = math.tanh %152 : vector<8x32xf32>
    %154 = arith.mulf %148, %153 : vector<8x32xf32>
    %cst_23 = arith.constant dense<0.000000e+00> : vector<8x32xf32>
    %155 = tpu.matmul %154, %3, %cst_23 {dimension_numbers = #tpu.dot_dimension_numbers<[1], [0], [0], [1], [0, 0, 1, 1], [], []>} : vector<8x32xf32>, vector<32x32xf32>, vector<8x32xf32> -> vector<8x32xf32>
    %156 = vector.broadcast %7 : vector<1x32xf32> to vector<8x32xf32>
    %157 = arith.addf %155, %156 : vector<8x32xf32>
    %cst_24 = arith.constant 0.000000e+00 : f32
    %158 = vector.broadcast %cst_24 : f32 to vector<8x32xf32>
    %159 = arith.maximumf %157, %158 : vector<8x32xf32>
    %cst_25 = arith.constant dense<0.000000e+00> : vector<8x128xf32>
    %160 = tpu.matmul %159, %4, %cst_25 {dimension_numbers = #tpu.dot_dimension_numbers<[1], [0], [0], [1], [0, 0, 1, 1], [], []>} : vector<8x32xf32>, vector<32x128xf32>, vector<8x128xf32> -> vector<8x128xf32>
    %161 = vector.broadcast %8 : vector<1x128xf32> to vector<8x128xf32>
    %162 = arith.addf %160, %161 : vector<8x128xf32>
    %163 = tpu.iota {dimensions = array<i32: 1>} : vector<8x128xi32>
    %c4_i32 = arith.constant 4 : i32
    %164 = vector.broadcast %c4_i32 : i32 to vector<8x128xi32>
    %165 = arith.cmpi slt, %163, %164 : vector<8x128xi32>
    %c4_i32_26 = arith.constant 4 : i32
    %166 = vector.broadcast %c4_i32_26 : i32 to vector<8x128xi32>
    %167 = arith.cmpi sge, %163, %166 : vector<8x128xi32>
    %c10_i32 = arith.constant 10 : i32
    %168 = vector.broadcast %c10_i32 : i32 to vector<8x128xi32>
    %169 = arith.cmpi slt, %163, %168 : vector<8x128xi32>
    %170 = arith.andi %167, %169 : vector<8x128xi1>
    %c10_i32_27 = arith.constant 10 : i32
    %171 = vector.broadcast %c10_i32_27 : i32 to vector<8x128xi32>
    %172 = arith.cmpi eq, %163, %171 : vector<8x128xi32>
    %c10_i32_28 = arith.constant 10 : i32
    %173 = vector.broadcast %c10_i32_28 : i32 to vector<8x128xi32>
    %174 = arith.cmpi sge, %163, %173 : vector<8x128xi32>
    %c12_i32 = arith.constant 12 : i32
    %175 = vector.broadcast %c12_i32 : i32 to vector<8x128xi32>
    %176 = arith.cmpi slt, %163, %175 : vector<8x128xi32>
    %177 = arith.andi %174, %176 : vector<8x128xi1>
    %cst_29 = arith.constant 0xFF800000 : f32
    %178 = vector.broadcast %cst_29 : f32 to vector<8x128xf32>
    %179 = arith.select %165, %162, %178 : vector<8x128xi1>, vector<8x128xf32>
    %cst_30 = arith.constant dense<0xFF800000> : vector<8xf32>
    %180 = vector.multi_reduction <maximumf>, %179, %cst_30 [1] : vector<8x128xf32> to vector<8xf32>
    %181 = vector.shape_cast %180 : vector<8xf32> to vector<8x1xf32>
    %cst_31 = arith.constant 0xFF800000 : f32
    %182 = vector.broadcast %cst_31 : f32 to vector<8x128xf32>
    %183 = arith.select %170, %162, %182 : vector<8x128xi1>, vector<8x128xf32>
    %cst_32 = arith.constant dense<0xFF800000> : vector<8xf32>
    %184 = vector.multi_reduction <maximumf>, %183, %cst_32 [1] : vector<8x128xf32> to vector<8xf32>
    %185 = vector.shape_cast %184 : vector<8xf32> to vector<8x1xf32>
    %cst_33 = arith.constant 0xFF800000 : f32
    %186 = vector.broadcast %cst_33 : f32 to vector<8x128xf32>
    %187 = arith.select %172, %162, %186 : vector<8x128xi1>, vector<8x128xf32>
    %cst_34 = arith.constant dense<0xFF800000> : vector<8xf32>
    %188 = vector.multi_reduction <maximumf>, %187, %cst_34 [1] : vector<8x128xf32> to vector<8xf32>
    %189 = vector.shape_cast %188 : vector<8xf32> to vector<8x1xf32>
    %cst_35 = arith.constant 0.000000e+00 : f32
    %190 = vector.broadcast %cst_35 : f32 to vector<8x1xf32>
    %191 = arith.maximumf %189, %190 : vector<8x1xf32>
    %192 = vector.shape_cast %185 : vector<8x1xf32> to vector<8x1xf32>
    %193 = vector.broadcast %192 : vector<8x1xf32> to vector<8x128xf32>
    %194 = vector.shape_cast %191 : vector<8x1xf32> to vector<8x1xf32>
    %195 = vector.broadcast %194 : vector<8x1xf32> to vector<8x128xf32>
    %196 = arith.select %170, %193, %195 : vector<8x128xi1>, vector<8x128xf32>
    %197 = vector.shape_cast %181 : vector<8x1xf32> to vector<8x1xf32>
    %198 = vector.broadcast %197 : vector<8x1xf32> to vector<8x128xf32>
    %199 = arith.select %165, %198, %196 : vector<8x128xi1>, vector<8x128xf32>
    %200 = arith.subf %162, %199 : vector<8x128xf32>
    %201 = math.exp %200 : vector<8x128xf32>
    %cst_36 = arith.constant 0.000000e+00 : f32
    %202 = vector.broadcast %cst_36 : f32 to vector<8x128xf32>
    %203 = arith.select %165, %201, %202 : vector<8x128xi1>, vector<8x128xf32>
    %cst_37 = arith.constant dense<0.000000e+00> : vector<8xf32>
    %204 = vector.multi_reduction <add>, %203, %cst_37 [1] : vector<8x128xf32> to vector<8xf32>
    %205 = vector.shape_cast %204 : vector<8xf32> to vector<8x1xf32>
    %cst_38 = arith.constant 0.000000e+00 : f32
    %206 = vector.broadcast %cst_38 : f32 to vector<8x128xf32>
    %207 = arith.select %170, %201, %206 : vector<8x128xi1>, vector<8x128xf32>
    %cst_39 = arith.constant dense<0.000000e+00> : vector<8xf32>
    %208 = vector.multi_reduction <add>, %207, %cst_39 [1] : vector<8x128xf32> to vector<8xf32>
    %209 = vector.shape_cast %208 : vector<8xf32> to vector<8x1xf32>
    %cst_40 = arith.constant 0.000000e+00 : f32
    %210 = vector.broadcast %cst_40 : f32 to vector<8x128xf32>
    %211 = arith.select %177, %201, %210 : vector<8x128xi1>, vector<8x128xf32>
    %cst_41 = arith.constant dense<0.000000e+00> : vector<8xf32>
    %212 = vector.multi_reduction <add>, %211, %cst_41 [1] : vector<8x128xf32> to vector<8xf32>
    %213 = vector.shape_cast %212 : vector<8xf32> to vector<8x1xf32>
    %214 = vector.shape_cast %209 : vector<8x1xf32> to vector<8x1xf32>
    %215 = vector.broadcast %214 : vector<8x1xf32> to vector<8x128xf32>
    %216 = vector.shape_cast %213 : vector<8x1xf32> to vector<8x1xf32>
    %217 = vector.broadcast %216 : vector<8x1xf32> to vector<8x128xf32>
    %218 = arith.select %170, %215, %217 : vector<8x128xi1>, vector<8x128xf32>
    %219 = vector.shape_cast %205 : vector<8x1xf32> to vector<8x1xf32>
    %220 = vector.broadcast %219 : vector<8x1xf32> to vector<8x128xf32>
    %221 = arith.select %165, %220, %218 : vector<8x128xi1>, vector<8x128xf32>
    %222 = arith.ori %165, %170 : vector<8x128xi1>
    %223 = arith.ori %222, %172 : vector<8x128xi1>
    %224 = arith.divf %201, %221 : vector<8x128xf32>
    %cst_42 = arith.constant 0.000000e+00 : f32
    %225 = vector.broadcast %cst_42 : f32 to vector<8x128xf32>
    %226 = arith.select %223, %224, %225 : vector<8x128xi1>, vector<8x128xf32>
    %c0_43 = arith.constant 0 : index
    %c0_44 = arith.constant 0 : index
    %227 = vector.load %arg2[%c0_43, %c0_44] : memref<8x128xf32, #tpu.memory_space<vmem>>, vector<8x128xf32>
    tpu.vector_store %arg2[%c0_43, %c0_44], %226 {strides = array<i32>} : memref<8x128xf32, #tpu.memory_space<vmem>>, vector<8x128xf32>,
    return
  }
}

</mosaic_0001>

<bundles_post_ra>
// kernel: tpu_custom_call.1
= control target key start
LH: loop header
LB: loop body
LE: loop exit
PB: predicated region body
PF: predicated region fallthrough
CT: control target
= control target key end

     0   :  { %7 = vsyncpa [#allocation3], 0  ;;  %s1817_s0 = inlined_call_operand.vmem [shape: f32[64,16], index: 0, kind: input, shape index: {}]   ;;  %s1818_s1 = inlined_call_operand.hbm [shape: f32[120,128], index: 1, kind: input, shape index: {}]   ;;  %s1819_s2 = inlined_call_operand.hbm [shape: f32[8,128], index: 2, kind: output, shape index: {}]  }
   0x1   :  { %8 = vsyncpa [#allocation4], 0  ;;  %s1536_s9 = smov [#allocation2]   ;;  %s1488_s13 = scalar_lea.hbm %s1818_s1, 1920 }
   0x2   :  { %s16_s10 = sshll.u32 %s1536_s9, 4  ;;  %p1489_p0 = scmp.ne.s32.totalorder %s1818_s1, %s1488_s13  ;;  %s17_s10 = int_to_ptr.vmem [resolvable:$true] %s16_s10 }
   0x3   :  { %p1492_p1 = scmp.lt.u32.totalorder %s1488_s13, %s1818_s1 }
   0x5   :  { %p1494_p2 = pnand %p1492_p1, %p1489_p0 }
   0x7   :  { %1497 = shalt.err (!%p1494_p2)
}
   0x8   :  { %s1498_s18 = scalar_lea.vmem %s17_s10, 1920  ;;  %p1503_p4 = scmp.lt.s32.totalorder %s17_s10, %s17_s10 }
   0x9   :  { %p1499_p3 = scmp.ne.s32.totalorder %s17_s10, %s1498_s18  ;;  %p1504_p5 = scmp.lt.s32.totalorder %s1498_s18, %s1498_s18 }
   0xb   :  { %p1505_p6 = por %p1504_p5, %p1503_p4 }
   0xd   :  { %p1506_p7 = pnand %p1505_p6, %p1499_p3 }
   0xf   :  { %1509 = shalt.err (!%p1506_p7)
}
  0x10   :  { %s1537_s19 = smov 128   ;;  %s1538_s20 = smov 8  }
  0x11   :  { %22 = dma.hbm_to_vmem [thread:$0]  %s1818_s1, 1920, %s17_s10, [#allocation3], %s1537_s19, %s1537_s19, %s1538_s20  }
  0x12   :  { %1532 = dma.done.wait [#allocation3], 1920  }
  0x13   :  { %1533 = vsyncadd [#allocation3], 4294965376  ;;  %v1539_v0 = vmov 0.0|0.0   ;;  %vm1540_vm0 = vmmov 0   ;;  %v1541_v1 = vmov 0.0   ;;  %vm53_vm1 = vcmask 130048  }
  0x14   :  { %1382 = vmatprep.subr.bf16.mxu1 %v1539_v0  ;;  %1276 = vmatprep.mubr.msk.f32.mxu1 %vm1540_vm0, %v1541_v1  ;;  %v26_v2 = vld [vmem:[#allocation2] sm:$0xff]  ;;  %v27_v3 = vld [vmem:[#allocation2 + $0x8] sm:$0xff]  ;;  %v28_v4 = vld [vmem:[#allocation2 + $0x10] sm:$0xff]  ;;  %v49_v13 = vlaneseq  ;;  %v1542_v22 = vmov 1.0   ;;  %s1543_s26 = smov 32   ;;  %s1544_s27 = smov 64  }
  0x15   :  { %v1378_v5 = vpack.c.bf16 %v27_v3, %v26_v2  ;;  %v29_v6 = vld [vmem:[#allocation2 + $0x18] sm:$0xff]  ;;  %v41_v7 = vld [vmem:[%s1817_s0] sm:$0xff]  ;;  %v31_v10 = vld [vmem:[#allocation2 + $0x28] sm:$0xff]  ;;  %vm188_vm3 = vcmask 261120  }
  0x16   :  { %v1579_v8 = vpack.c.bf16 %v29_v6, %v28_v4  ;;  %1256 = vmatprep.mubr.msk.f32.mxu0 %vm53_vm1, %v41_v7  ;;  %v30_v9 = vld [vmem:[#allocation2 + $0x20] sm:$0xff]  ;;  %v42_v11 = vld [vmem:[%s1817_s0 + $0x8] sm:$0xff]  ;;  %v1604_v14 = vshrl.u32 %v49_v13, 7  ;;  %v1607_v16 = vld [vmem:[#allocation2 + $0x70] sm:$0xff]  ;;  %v1609_v17 = vand.u32 127, %v49_v13 }
  0x17   :  { %1379 = vmatprep.subr.bf16.mxu0 %v1378_v5  ;;  %v1586_v12 = vpack.c.bf16 %v31_v10, %v30_v9  ;;  %v43_v54 = vld [vmem:[%s1817_s0 + $0x10] sm:$0xff]  ;;  %v44_v55 = vld [vmem:[%s1817_s0 + $0x18] sm:$0xff]  ;;  %v45_v56 = vld [vmem:[%s1817_s0 + $0x20] sm:$0xff] }
  0x18   :  { %1384 = vmatpush3.bf16.msra.mxu1 %v1579_v8  ;;  %1381 = vmatpush3.bf16.msra.mxu0 %v1378_v5  ;;  %v51_v15 = vsub.s32 0, %v1604_v14  ;;  %vm185_vm2 = vcmp.lt.s32.totalorder %v1609_v17, 96  ;;  %v46_v57 = vld [vmem:[%s1817_s0 + $0x28] sm:$0xff]  ;;  %v47_v58 = vld [vmem:[%s1817_s0 + $0x30] sm:$0xff]  ;;  %v48_v59 = vld [vmem:[%s1817_s0 + $0x38] sm:$0xff]  ;;  %vm1121_vm4 = vcmp.ge.s32.totalorder %v1609_v17, 4 }
  0x19   :  { %1385 = vmatprep.subr.bf16.mxu1 %v1539_v0  ;;  %1394 = vmatprep.subr.bf16.mxu0 %v1539_v0  ;;  %v1616_v23 = vsel %vm185_vm2, 0.5, %v1542_v22  ;;  %v1620_v29 = vsel %vm185_vm2, 0.5, %v1541_v1  ;;  %vm1122_vm5 = vcmp.lt.s32.totalorder %v1609_v17, 10  ;;  %vm1124_vm7 = vcmp.eq.s32.totalorder %v1609_v17, 10  ;;  %s1545_s0 = smov [#allocation5]  }
  0x1a   :  { %v1612_v18 = vrot.slane %v1607_v16, %v51_v15  ;;  %vm1773_vm6 = vmand %vm1121_vm4, %vm1122_vm5  ;;  %vm1120_vm8 = vcmp.lt.s32.totalorder %v1609_v17, 4  ;;  %vm1125_vm9 = vcmp.ge.s32.totalorder %v1609_v17, 10  ;;  %vm1126_vm10 = vcmp.lt.s32.totalorder %v1609_v17, 12  ;;  %s1166_s12 = sshll.u32 %s1545_s0, 4  ;;  %s1167_s12 = int_to_ptr.vmem [resolvable:$true] %s1166_s12 }
  0x1b   :  { %1257 = vmatmul.mubr.msk.f32.vlgmr.msra.gmra.mrb[0].mxu0 %vm53_vm1, %v42_v11  ;;  %vm1127_vm11 = vmand %vm1125_vm9, %vm1126_vm10  ;;  %s1510_s13 = scalar_lea.vmem %s1167_s12, 128  ;;  %p1515_p9 = scmp.lt.s32.totalorder %s1167_s12, %s1167_s12 }
  0x1c   :  { %1387 = vmatpush3.bf16.msra.mxu1 %v1586_v12  ;;  %1396 = vmatpush3.bf16.msra.mxu0 %v1579_v8  ;;  %vm1154_vm12 = vmor %vm1120_vm8, %vm1773_vm6  ;;  %p1511_p8 = scmp.ne.s32.totalorder %s1167_s12, %s1510_s13  ;;  %p1516_p10 = scmp.lt.s32.totalorder %s1510_s13, %s1510_s13 }
  0x1d   :  { %1388 = vmatprep.subr.bf16.mxu1 %v1539_v0  ;;  %1397 = vmatprep.subr.bf16.mxu0 %v1539_v0  ;;  %vm1155_vm13 = vmor %vm1154_vm12, %vm1124_vm7 }
  0x1e   :  { %1259 = vmatprep.mubr.msk.f32.mxu0 %vm53_vm1, %v43_v54  ;;  %p1517_p11 = por %p1516_p10, %p1515_p9 }
  0x1f   :  { %1277 = vmatmul.mubr.f32.vlgmr.msra.gmra.mrb[0].mxu1 %v1541_v1  ;;  %1260 = vmatmul.mubr.msk.f32.gmra.mrb[2].mxu0 %vm53_vm1, %v44_v55 }
  0x20   :  { %1390 = vmatpush3.bf16.msra.mxu1 %v1579_v8  ;;  %1287 = vmatprep.mubr.msk.f32.mxu1 %vm1540_vm0, %v1541_v1  ;;  %p1518_p12 = pnand %p1517_p11, %p1511_p8 }
  0x21   :  { %1391 = vmatprep.subr.bf16.mxu1 %v1539_v0  ;;  %1399 = vmatpush3.bf16.msra.mxu0 %v1586_v12 }
  0x22   :  { %1406 = vmatprep.subr.bf16.mxu0 %v1539_v0  ;;  %1262 = vmatprep.mubr.msk.f32.mxu0 %vm53_vm1, %v45_v56 }
  0x23   :  { %1263 = vmatmul.mubr.msk.f32.gmra.mrb[4].mxu0 %vm53_vm1, %v46_v57 }
  0x24   :  { %1393 = vmatpush3.bf16.msra.mxu1 %v1586_v12  ;;  %1265 = vmatprep.mubr.msk.f32.mxu0 %vm53_vm1, %v47_v58 }
  0x25   :  { %1400 = vmatprep.subr.bf16.mxu1 %v1539_v0 }
  0x27   :  { %1266 = vmatmul.mubr.msk.f32.gmra.mrb[6].mxu0 %vm53_vm1, %v48_v59 }
  0x28   :  { %1298 = vmatprep.mubr.msk.f32.mxu0 %vm1540_vm0, %v1541_v1 }
  0xee   :  { %v1258_v19 = vpop.f32.mrb[0].mxu0 }
  0xef   :  { %v144_v20 = vpop.f32.mrb[1].mxu0  ;;  %v150_v41 = vadd.f32 %v1258_v19, %v1612_v18 }
  0xf0   :  { %v145_v21 = vadd.f32 %v144_v20, %v1612_v18 }
  0xf2   :  { %v258_v24 = vpop.f32.mrb[0].mxu1  ;;  %v1261_v63 = vpop.f32.mrb[2].mxu0 }
  0xf3   :  { %v262_v25 = vadd.f32 %v258_v24, %v145_v21  ;;  %v1278_v26 = vpop.f32.mrb[1].mxu1  ;;  %v154_v2 = vpop.f32.mrb[3].mxu0 }
  0xf4   :  { %v155_v9 = vadd.f32 %v154_v2, %v1612_v18 }
  0xf5   :  { %v263_v27 = vmul.f32 %v262_v25, %v1616_v23 }
  0xf6   :  { %v1669_v3 = vpop.f32.mrb[4].mxu0 }
  0xf7   :  { %1452 = vtanh.f32 %v263_v27  ;;  %v1671_v4 = vpop.f32.mrb[5].mxu0 }
  0xfa   :  { %v1673_v5 = vpop.f32.mrb[6].mxu0 }
  0xfb   :  { %v1675_v6 = vpop.f32.mrb[7].mxu0 }
 0x101   :  { %v1453_v28 = vpop.eup %1452 }
 0x102   :  { %v265_v30 = vmul.f32 %v1453_v28, %v1616_v23 }
 0x104   :  { %v266_v31 = vadd.f32 %v265_v30, %v1620_v29 }
 0x106   :  { %269 = vrot.lane.b32.xlu0 %v266_v31, %s1543_s26  ;;  %v267_v34 = vmul.f32 0.0, %v266_v31 }
 0x178   :  { %v270_v32 = vpop.permute.xlu0 %269 }
 0x179   :  { %v272_v33 = vmul.f32 %v270_v32, %v266_v31 }
 0x17b   :  { %274 = vrot.lane.b32.xlu0 %v272_v33, %s1543_s26  ;;  %v160_v33 = vadd.f32 %v1261_v63, %v1612_v18 }
 0x1ed   :  { %v275_v35 = vpop.permute.xlu0 %274 }
 0x1ee   :  { %v277_v36 = vadd.f32 %v275_v35, %v267_v34 }
 0x1f0   :  { %1454 = vtanh.f32 %v277_v36 }
 0x1fa   :  { %v1455_v37 = vpop.eup %1454 }
 0x1fb   :  { %280 = vrot.lane.b32.xlu1 %v1455_v37, %s1543_s26 }
 0x26d   :  { %v281_v38 = vpop.permute.xlu1 %280 }
 0x26e   :  { %v283_v39 = vmul.f32 %v281_v38, %v266_v31 }
 0x270   :  { %285 = vrot.lane.b32.xlu1 %v283_v39, %s1544_s27 }
 0x2e2   :  { %v286_v40 = vpop.permute.xlu1 %285 }
 0x2e3   :  { %1288 = vmatmul.mubr.msk.f32.vlgmr.msra.gmra.mrb[2].mxu1 %vm188_vm3, %v286_v40 }
 0x2e4   :  { %1402 = vmatpush3.bf16.msra.mxu1 %v1579_v8  ;;  %1309 = vmatprep.mubr.msk.f32.mxu1 %vm1540_vm0, %v1541_v1 }
 0x2e5   :  { %1403 = vmatprep.subr.bf16.mxu1 %v1539_v0 }
 0x2e8   :  { %1405 = vmatpush3.bf16.msra.mxu1 %v1586_v12 }
 0x2e9   :  { %1412 = vmatprep.subr.bf16.mxu1 %v1539_v0 }
 0x3b6   :  { %v355_v42 = vpop.f32.mrb[2].mxu1 }
 0x3b7   :  { %v359_v43 = vadd.f32 %v355_v42, %v150_v41  ;;  %v1289_v44 = vpop.f32.mrb[3].mxu1 }
 0x3b9   :  { %v360_v45 = vmul.f32 %v359_v43, %v1616_v23 }
 0x3bb   :  { %1456 = vtanh.f32 %v360_v45 }
 0x3c5   :  { %v1457_v46 = vpop.eup %1456 }
 0x3c6   :  { %v362_v47 = vmul.f32 %v1457_v46, %v1616_v23 }
 0x3c8   :  { %v363_v48 = vadd.f32 %v362_v47, %v1620_v29 }
 0x3ca   :  { %366 = vrot.lane.b32.xlu0 %v363_v48, %s1543_s26  ;;  %v364_v51 = vmul.f32 %v363_v48, %v277_v36 }
 0x43c   :  { %v367_v49 = vpop.permute.xlu0 %366 }
 0x43d   :  { %v369_v50 = vmul.f32 %v367_v49, %v363_v48 }
 0x43f   :  { %371 = vrot.lane.b32.xlu1 %v369_v50, %s1543_s26  ;;  %v165_v50 = vadd.f32 %v1671_v4, %v1612_v18 }
 0x4b1   :  { %v372_v52 = vpop.permute.xlu1 %371 }
 0x4b2   :  { %v374_v53 = vadd.f32 %v372_v52, %v364_v51 }
 0x4b4   :  { %1458 = vtanh.f32 %v374_v53 }
 0x4be   :  { %v1459_v60 = vpop.eup %1458 }
 0x4bf   :  { %377 = vrot.lane.b32.xlu0 %v1459_v60, %s1543_s26 }
 0x531   :  { %v378_v61 = vpop.permute.xlu0 %377 }
 0x532   :  { %v380_v62 = vmul.f32 %v378_v61, %v363_v48 }
 0x534   :  { %382 = vrot.lane.b32.xlu1 %v380_v62, %s1544_s27 }
 0x5a6   :  { %v383_v7 = vpop.permute.xlu1 %382 }
 0x5a7   :  { %1299 = vmatmul.mubr.msk.f32.vlgmr.msra.gmra.mrb[8].mxu0 %vm188_vm3, %v383_v7 }
 0x5a8   :  { %1408 = vmatpush3.bf16.msra.mxu0 %v1579_v8  ;;  %1320 = vmatprep.mubr.msk.f32.mxu0 %vm1540_vm0, %v1541_v1 }
 0x5a9   :  { %1409 = vmatprep.subr.bf16.mxu0 %v1539_v0 }
 0x5ac   :  { %1411 = vmatpush3.bf16.msra.mxu0 %v1586_v12 }
 0x5ad   :  { %1418 = vmatprep.subr.bf16.mxu0 %v1539_v0 }
 0x67a   :  { %v452_v10 = vpop.f32.mrb[8].mxu0 }
 0x67b   :  { %v456_v11 = vadd.f32 %v452_v10, %v155_v9  ;;  %v1300_v13 = vpop.f32.mrb[9].mxu0  ;;  %v170_v9 = vadd.f32 %v1669_v3, %v1612_v18 }
 0x67d   :  { %v457_v15 = vmul.f32 %v456_v11, %v1616_v23 }
 0x67f   :  { %1460 = vtanh.f32 %v457_v15 }
 0x689   :  { %v1461_v19 = vpop.eup %1460 }
 0x68a   :  { %v459_v20 = vmul.f32 %v1461_v19, %v1616_v23 }
 0x68c   :  { %v460_v21 = vadd.f32 %v459_v20, %v1620_v29 }
 0x68e   :  { %463 = vrot.lane.b32.xlu0 %v460_v21, %s1543_s26  ;;  %v461_v25 = vmul.f32 %v460_v21, %v374_v53 }
 0x700   :  { %v464_v22 = vpop.permute.xlu0 %463 }
 0x701   :  { %v466_v24 = vmul.f32 %v464_v22, %v460_v21 }
 0x703   :  { %468 = vrot.lane.b32.xlu1 %v466_v24, %s1543_s26 }
 0x775   :  { %v469_v26 = vpop.permute.xlu1 %468 }
 0x776   :  { %v471_v27 = vadd.f32 %v469_v26, %v461_v25 }
 0x778   :  { %1462 = vtanh.f32 %v471_v27 }
 0x782   :  { %v1463_v28 = vpop.eup %1462 }
 0x783   :  { %474 = vrot.lane.b32.xlu0 %v1463_v28, %s1543_s26 }
 0x7f5   :  { %v475_v30 = vpop.permute.xlu0 %474 }
 0x7f6   :  { %v477_v31 = vmul.f32 %v475_v30, %v460_v21  ;;  %v175_v30 = vadd.f32 %v1675_v6, %v1612_v18 }
 0x7f8   :  { %479 = vrot.lane.b32.xlu1 %v477_v31, %s1544_s27 }
 0x86a   :  { %v480_v32 = vpop.permute.xlu1 %479 }
 0x86b   :  { %1310 = vmatmul.mubr.msk.f32.vlgmr.msra.gmra.mrb[4].mxu1 %vm188_vm3, %v480_v32 }
 0x86c   :  { %1414 = vmatpush3.bf16.msra.mxu1 %v1579_v8  ;;  %1331 = vmatprep.mubr.msk.f32.mxu1 %vm1540_vm0, %v1541_v1 }
 0x86d   :  { %1415 = vmatprep.subr.bf16.mxu1 %v1539_v0 }
 0x870   :  { %1417 = vmatpush3.bf16.msra.mxu1 %v1586_v12 }
 0x871   :  { %1424 = vmatprep.subr.bf16.mxu1 %v1539_v0 }
 0x93e   :  { %v549_v34 = vpop.f32.mrb[4].mxu1 }
 0x93f   :  { %v553_v35 = vadd.f32 %v549_v34, %v160_v33  ;;  %v1311_v36 = vpop.f32.mrb[5].mxu1 }
 0x941   :  { %v554_v37 = vmul.f32 %v553_v35, %v1616_v23 }
 0x943   :  { %1464 = vtanh.f32 %v554_v37 }
 0x94d   :  { %v1465_v38 = vpop.eup %1464 }
 0x94e   :  { %v556_v39 = vmul.f32 %v1465_v38, %v1616_v23 }
 0x950   :  { %v557_v40 = vadd.f32 %v556_v39, %v1620_v29 }
 0x952   :  { %560 = vrot.lane.b32.xlu0 %v557_v40, %s1543_s26  ;;  %v558_v43 = vmul.f32 %v557_v40, %v471_v27 }
 0x9c4   :  { %v561_v41 = vpop.permute.xlu0 %560 }
 0x9c5   :  { %v563_v42 = vmul.f32 %v561_v41, %v557_v40 }
 0x9c7   :  { %565 = vrot.lane.b32.xlu1 %v563_v42, %s1543_s26 }
 0xa39   :  { %v566_v44 = vpop.permute.xlu1 %565 }
 0xa3a   :  { %v568_v45 = vadd.f32 %v566_v44, %v558_v43 }
 0xa3c   :  { %1466 = vtanh.f32 %v568_v45 }
 0xa46   :  { %v1467_v46 = vpop.eup %1466 }
 0xa47   :  { %571 = vrot.lane.b32.xlu0 %v1467_v46, %s1543_s26  ;;  %v180_v46 = vadd.f32 %v1673_v5, %v1612_v18  ;;  %v32_v5 = vld [vmem:[#allocation2 + $0x30] sm:$0xff] }
 0xab9   :  { %v572_v47 = vpop.permute.xlu0 %571 }
 0xaba   :  { %v574_v48 = vmul.f32 %v572_v47, %v557_v40 }
 0xabc   :  { %576 = vrot.lane.b32.xlu1 %v574_v48, %s1544_s27 }
 0xb2e   :  { %v577_v49 = vpop.permute.xlu1 %576 }
 0xb2f   :  { %1321 = vmatmul.mubr.msk.f32.vlgmr.msra.gmra.mrb[10].mxu0 %vm188_vm3, %v577_v49 }
 0xb30   :  { %1420 = vmatpush3.bf16.msra.mxu0 %v1579_v8  ;;  %1342 = vmatprep.mubr.msk.f32.mxu0 %vm1540_vm0, %v1541_v1 }
 0xb31   :  { %1421 = vmatprep.subr.bf16.mxu0 %v1539_v0 }
 0xb34   :  { %1423 = vmatpush3.bf16.msra.mxu0 %v1586_v12 }
 0xb35   :  { %1430 = vmatprep.subr.bf16.mxu0 %v1539_v0 }
 0xc02   :  { %v646_v51 = vpop.f32.mrb[10].mxu0 }
 0xc03   :  { %v650_v52 = vadd.f32 %v646_v51, %v165_v50  ;;  %v1322_v53 = vpop.f32.mrb[11].mxu0 }
 0xc05   :  { %v651_v54 = vmul.f32 %v650_v52, %v1616_v23 }
 0xc07   :  { %1468 = vtanh.f32 %v651_v54 }
 0xc11   :  { %v1469_v55 = vpop.eup %1468 }
 0xc12   :  { %v653_v56 = vmul.f32 %v1469_v55, %v1616_v23 }
 0xc14   :  { %v654_v57 = vadd.f32 %v653_v56, %v1620_v29 }
 0xc16   :  { %657 = vrot.lane.b32.xlu0 %v654_v57, %s1543_s26  ;;  %v655_v60 = vmul.f32 %v654_v57, %v568_v45 }
 0xc88   :  { %v658_v58 = vpop.permute.xlu0 %657 }
 0xc89   :  { %v660_v59 = vmul.f32 %v658_v58, %v654_v57  ;;  %v34_v58 = vld [vmem:[#allocation2 + $0x40] sm:$0xff] }
 0xc8b   :  { %662 = vrot.lane.b32.xlu1 %v660_v59, %s1543_s26 }
 0xcfd   :  { %v663_v61 = vpop.permute.xlu1 %662 }
 0xcfe   :  { %v665_v62 = vadd.f32 %v663_v61, %v655_v60  ;;  %v35_v60 = vld [vmem:[#allocation2 + $0x48] sm:$0xff] }
 0xcff   :  { %v1434_v61 = vpack.c.bf16 %v35_v60, %v34_v58 }
 0xd00   :  { %1470 = vtanh.f32 %v665_v62 }
 0xd0a   :  { %v1471_v63 = vpop.eup %1470 }
 0xd0b   :  { %668 = vrot.lane.b32.xlu0 %v1471_v63, %s1543_s26 }
 0xd7d   :  { %v669_v2 = vpop.permute.xlu0 %668 }
 0xd7e   :  { %v671_v4 = vmul.f32 %v669_v2, %v654_v57  ;;  %v33_v57 = vld [vmem:[#allocation2 + $0x38] sm:$0xff] }
 0xd7f   :  { %v1431_v59 = vpack.c.bf16 %v33_v57, %v32_v5 }
 0xd80   :  { %673 = vrot.lane.b32.xlu1 %v671_v4, %s1544_s27 }
 0xdf2   :  { %v674_v7 = vpop.permute.xlu1 %673 }
 0xdf3   :  { %1332 = vmatmul.mubr.msk.f32.vlgmr.msra.gmra.mrb[6].mxu1 %vm188_vm3, %v674_v7 }
 0xdf4   :  { %1426 = vmatpush3.bf16.msra.mxu1 %v1579_v8  ;;  %1353 = vmatprep.mubr.msk.f32.mxu1 %vm1540_vm0, %v1541_v1 }
 0xdf5   :  { %1427 = vmatprep.subr.bf16.mxu1 %v1539_v0 }
 0xdf8   :  { %1429 = vmatpush3.bf16.msra.mxu1 %v1586_v12 }
 0xdf9   :  { %1436 = vmatprep.subr.bf16.mxu1 %v1539_v0 }
 0xec6   :  { %v743_v10 = vpop.f32.mrb[6].mxu1 }
 0xec7   :  { %v747_v11 = vadd.f32 %v743_v10, %v170_v9  ;;  %v1333_v13 = vpop.f32.mrb[7].mxu1  ;;  %v38_v9 = vld [vmem:[#allocation2 + $0x60] sm:$0xff]  ;;  %v39_v10 = vld [vmem:[#allocation2 + $0x68] sm:$0xff] }
 0xec8   :  { %v965_v13 = vsub.s32 1, %v1604_v14 }
 0xec9   :  { %v748_v15 = vmul.f32 %v747_v11, %v1616_v23  ;;  %v1440_v11 = vpack.c.bf16 %v39_v10, %v38_v9 }
 0xecb   :  { %1472 = vtanh.f32 %v748_v15  ;;  %v966_v15 = vrot.slane %v1607_v16, %v965_v13 }
 0xed5   :  { %v1473_v19 = vpop.eup %1472 }
 0xed6   :  { %v750_v8 = vmul.f32 %v1473_v19, %v1616_v23 }
 0xed8   :  { %v751_v20 = vadd.f32 %v750_v8, %v1620_v29 }
 0xeda   :  { %754 = vrot.lane.b32.xlu0 %v751_v20, %s1543_s26  ;;  %v752_v22 = vmul.f32 %v751_v20, %v665_v62  ;;  %v37_v62 = vld [vmem:[#allocation2 + $0x58] sm:$0xff] }
 0xf4c   :  { %v755_v21 = vpop.permute.xlu0 %754 }
 0xf4d   :  { %v757_v12 = vmul.f32 %v755_v21, %v751_v20 }
 0xf4f   :  { %759 = vrot.lane.b32.xlu1 %v757_v12, %s1543_s26 }
 0xfc1   :  { %v760_v24 = vpop.permute.xlu1 %759 }
 0xfc2   :  { %v762_v3 = vadd.f32 %v760_v24, %v752_v22 }
 0xfc4   :  { %1474 = vtanh.f32 %v762_v3 }
 0xfce   :  { %v1475_v25 = vpop.eup %1474 }
 0xfcf   :  { %765 = vrot.lane.b32.xlu0 %v1475_v25, %s1543_s26 }
0x1041   :  { %v766_v26 = vpop.permute.xlu0 %765 }
0x1042   :  { %v768_v27 = vmul.f32 %v766_v26, %v751_v20 }
0x1044   :  { %770 = vrot.lane.b32.xlu1 %v768_v27, %s1544_s27 }
0x10b6   :  { %v771_v28 = vpop.permute.xlu1 %770 }
0x10b7   :  { %1343 = vmatmul.mubr.msk.f32.vlgmr.msra.gmra.mrb[12].mxu0 %vm188_vm3, %v771_v28 }
0x10b8   :  { %1364 = vmatprep.mubr.msk.f32.mxu0 %vm1540_vm0, %v1541_v1  ;;  %1432 = vmatpush3.bf16.msra.mxu0 %v1431_v59 }
0x10b9   :  { %1433 = vmatprep.subr.bf16.mxu0 %v1539_v0 }
0x10bc   :  { %1435 = vmatpush3.bf16.msra.mxu0 %v1434_v61 }
0x118a   :  { %v840_v31 = vpop.f32.mrb[12].mxu0 }
0x118b   :  { %v844_v32 = vadd.f32 %v840_v31, %v175_v30  ;;  %v1344_v33 = vpop.f32.mrb[13].mxu0 }
0x118d   :  { %v845_v34 = vmul.f32 %v844_v32, %v1616_v23 }
0x118f   :  { %1476 = vtanh.f32 %v845_v34 }
0x1199   :  { %v1477_v35 = vpop.eup %1476 }
0x119a   :  { %v847_v36 = vmul.f32 %v1477_v35, %v1616_v23 }
0x119c   :  { %v848_v37 = vadd.f32 %v847_v36, %v1620_v29 }
0x119e   :  { %851 = vrot.lane.b32.xlu0 %v848_v37, %s1543_s26  ;;  %v849_v40 = vmul.f32 %v848_v37, %v762_v3 }
0x1210   :  { %v852_v38 = vpop.permute.xlu0 %851 }
0x1211   :  { %v854_v39 = vmul.f32 %v852_v38, %v848_v37 }
0x1213   :  { %856 = vrot.lane.b32.xlu1 %v854_v39, %s1543_s26 }
0x1285   :  { %v857_v41 = vpop.permute.xlu1 %856 }
0x1286   :  { %v859_v6 = vadd.f32 %v857_v41, %v849_v40 }
0x1288   :  { %1478 = vtanh.f32 %v859_v6 }
0x1292   :  { %v1479_v42 = vpop.eup %1478 }
0x1293   :  { %862 = vrot.lane.b32.xlu0 %v1479_v42, %s1543_s26 }
0x1305   :  { %v863_v43 = vpop.permute.xlu0 %862 }
0x1306   :  { %v865_v44 = vmul.f32 %v863_v43, %v848_v37 }
0x1308   :  { %867 = vrot.lane.b32.xlu1 %v865_v44, %s1544_s27 }
0x137a   :  { %v868_v45 = vpop.permute.xlu1 %867 }
0x137b   :  { %1354 = vmatmul.mubr.msk.f32.vlgmr.msra.gmra.mrb[8].mxu1 %vm188_vm3, %v868_v45 }
0x137c   :  { %1375 = vmatprep.mubr.msk.f32.mxu1 %vm1540_vm0, %v1541_v1 }
0x144e   :  { %v937_v47 = vpop.f32.mrb[8].mxu1 }
0x144f   :  { %v941_v48 = vadd.f32 %v937_v47, %v180_v46  ;;  %v1355_v49 = vpop.f32.mrb[9].mxu1 }
0x1451   :  { %v942_v50 = vmul.f32 %v941_v48, %v1616_v23 }
0x1453   :  { %1480 = vtanh.f32 %v942_v50 }
0x145d   :  { %v1481_v51 = vpop.eup %1480 }
0x145e   :  { %v944_v52 = vmul.f32 %v1481_v51, %v1616_v23 }
0x1460   :  { %v945_v53 = vadd.f32 %v944_v52, %v1620_v29  ;;  %v36_v29 = vld [vmem:[#allocation2 + $0x50] sm:$0xff] }
0x1461   :  { %v1437_v63 = vpack.c.bf16 %v37_v62, %v36_v29 }
0x1462   :  { %948 = vrot.lane.b32.xlu0 %v945_v53, %s1543_s26  ;;  %v946_v1 = vmul.f32 %v945_v53, %v859_v6 }
0x1463   :  { %1438 = vmatpush3.bf16.msra.mxu1 %v1437_v63 }
0x1464   :  { %1439 = vmatprep.subr.bf16.mxu1 %v1539_v0  ;;  %v1045_v0 = vsub.s32 2, %v1604_v14 }
0x1466   :  { %v1046_v12 = vrot.slane %v1607_v16, %v1045_v0 }
0x1467   :  { %1441 = vmatpush3.bf16.msra.mxu1 %v1440_v11 }
0x14d4   :  { %v949_v54 = vpop.permute.xlu0 %948 }
0x14d5   :  { %v951_v55 = vmul.f32 %v949_v54, %v945_v53 }
0x14d7   :  { %953 = vrot.lane.b32.xlu1 %v951_v55, %s1543_s26 }
0x1549   :  { %v954_v56 = vpop.permute.xlu1 %953 }
0x154a   :  { %v956_v18 = vadd.f32 %v954_v56, %v946_v1 }
0x154c   :  { %1482 = vtanh.f32 %v956_v18 }
0x1556   :  { %v1483_v23 = vpop.eup %1482 }
0x1557   :  { %959 = vrot.lane.b32.xlu0 %v1483_v23, %s1543_s26 }
0x15c9   :  { %v960_v2 = vpop.permute.xlu0 %959 }
0x15ca   :  { %v962_v4 = vmul.f32 %v960_v2, %v945_v53 }
0x15cc   :  { %968 = vrot.lane.b32.xlu1 %v962_v4, %s1544_s27 }
0x163e   :  { %v969_v7 = vpop.permute.xlu1 %968 }
0x163f   :  { %1365 = vmatmul.mubr.msk.f32.vlgmr.msra.gmra.mrb[14].mxu0 %vm188_vm3, %v969_v7 }
0x1712   :  { %v1038_v19 = vpop.f32.mrb[14].mxu0 }
0x1713   :  { %v1039_v8 = vadd.f32 %v1038_v19, %v966_v15  ;;  %v1366_v20 = vpop.f32.mrb[15].mxu0 }
0x1715   :  { %v1042_v21 = vmax.f32 %v1039_v8, 0.0 }
0x1717   :  { %1376 = vmatmul.mubr.msk.f32.vlgmr.msra.gmra.mrb[10].mxu1 %vm188_vm3, %v1042_v21 }
0x17ea   :  { %v1116_v22 = vpop.f32.mrb[10].mxu1 }
0x17eb   :  { %v1117_v3 = vadd.f32 %v1116_v22, %v1046_v12  ;;  %v1377_v25 = vpop.f32.mrb[11].mxu1 }
0x17ed   :  { %v1134_v26 = vsel %vm1124_vm7, %v1117_v3, -inf  ;;  %v1131_v14 = vsel %vm1773_vm6, %v1117_v3, -inf  ;;  %v1128_v16 = vsel %vm1120_vm8, %v1117_v3, -inf }
0x17ee   :  { %1135 = vmax.xlane.f32.xlu0 %v1134_v26  ;;  %1132 = vmax.xlane.f32.xlu1 %v1131_v14 }
0x17f2   :  { %1129 = vmax.xlane.f32.xlu0 %v1128_v16 }
0x187b   :  { %v1136_v27 = vpop.xlane.xlu0 %1135  ;;  %v1133_v30 = vpop.xlane.xlu1 %1132 }
0x187c   :  { %v1137_v28 = vmax.f32 %v1136_v27, 0.0 }
0x187e   :  { %v1138_v31 = vsel %vm1773_vm6, %v1133_v30, %v1137_v28 }
0x187f   :  { %v1130_v32 = vpop.xlane.xlu0 %1129 }
0x1880   :  { %v1139_v33 = vsel %vm1120_vm8, %v1130_v32, %v1138_v31 }
0x1881   :  { %v1140_v34 = vsub.f32 %v1117_v3, %v1139_v33 }
0x1883   :  { %v1141_v35 = vmul.f32 1.442695, %v1140_v34 }
0x1885   :  { %1484 = vpow2.f32 %v1141_v35 }
0x188f   :  { %v1485_v36 = vpop.eup %1484 }
0x1890   :  { %v1149_v37 = vsel %vm1127_vm11, %v1485_v36, 0.0  ;;  %v1146_v38 = vsel %vm1773_vm6, %v1485_v36, 0.0  ;;  %v1143_v39 = vsel %vm1120_vm8, %v1485_v36, 0.0 }
0x1891   :  { %1150 = vadd.xlane.f32.xlu1 %v1149_v37  ;;  %1147 = vadd.xlane.f32.xlu0 %v1146_v38 }
0x1895   :  { %1144 = vadd.xlane.f32.xlu0 %v1143_v39 }
0x191e   :  { %v1148_v40 = vpop.xlane.xlu0 %1147  ;;  %v1151_v41 = vpop.xlane.xlu1 %1150 }
0x191f   :  { %v1152_v6 = vsel %vm1773_vm6, %v1148_v40, %v1151_v41 }
0x1922   :  { %v1145_v42 = vpop.xlane.xlu0 %1144 }
0x1923   :  { %v1153_v43 = vsel %vm1120_vm8, %v1145_v42, %v1152_v6 }
0x1924   :  { %1486 = vrcp.f32 %v1153_v43 }
0x192e   :  { %v1487_v44 = vpop.eup %1486 }
0x192f   :  { %v1157_v45 = vmul.f32 %v1487_v44, %v1485_v36 }
0x1931   :  { %v1158_v46 = vsel %vm1155_vm13, %v1157_v45, 0.0 }
0x1932   :  { %1159 = vst [vmem:[#allocation5] sm:$0xff] %v1158_v46 }
0x1933   :  { %1521 = shalt.err (!%p1518_p12)
}
0x1934   :  { %s1522_s16 = scalar_lea.hbm %s1819_s2, 128 }
0x1935   :  { %p1523_p13 = scmp.ne.s32.totalorder %s1819_s2, %s1522_s16  ;;  %p1526_p0 = scmp.lt.u32.totalorder %s1522_s16, %s1819_s2 }
0x1937   :  { %p1528_p1 = pnand %p1526_p0, %p1523_p13 }
0x1939   :  { %1531 = shalt.err (!%p1528_p1)
}
0x193a   :  { %1169 = dma.vmem_to_hbm [thread:$0]  %s1167_s12, 128, %s1819_s2, [#allocation4]  }
0x193b   :  { %1534 = dma.done.wait [#allocation4], 128  }
0x193c   :  { %1535 = vsyncadd [#allocation4], 4294967168 }
0x193d   :  { %1173 = vsyncpa [#allocation3], 1 }
0x193e   :  { %1174 = vsyncpa [#allocation4], 1 }

</bundles_post_ra>
